<compile_context>
chip_gen: v7x
topology: tpu7x:2x2x1
jax: 0.10.0
libtpu: 0.0.40
codegen_flags: <defaults>
</compile_context>

<pallas_src>
import math
from functools import partial

import numpy as np
import jax
import jax.numpy as jnp
from jax.experimental import pallas as pl
from jax.experimental.pallas import tpu as pltpu


# -----------------------------------------------------------------------------
# Deterministic parameter construction (mirrors the PyTorch __init__ buffers)
# -----------------------------------------------------------------------------
def compute_gaussian_levels(bits: int = 4) -> np.ndarray:
    """Lloyd-Max quantization levels for a standard normal (closed-form integrals)."""
    n = 2 ** bits
    levels = np.linspace(-3.0, 3.0, n)

    def phi(x):   # standard normal pdf
        return math.exp(-0.5 * x * x) / math.sqrt(2.0 * math.pi)

    def Phi(x):   # standard normal cdf
        return 0.5 * (1.0 + math.erf(x / math.sqrt(2.0)))

    for _ in range(20):
        boundaries = np.zeros(n + 1)
        boundaries[1:-1] = (levels[1:] + levels[:-1]) / 2.0
        boundaries[0] = -np.inf
        boundaries[-1] = np.inf
        new_levels = []
        for i in range(n):
            a, b = boundaries[i], boundaries[i + 1]
            pa = 0.0 if np.isinf(a) else phi(a)
            pb = 0.0 if np.isinf(b) else phi(b)
            Pa = 0.0 if a == -np.inf else Phi(a)
            Pb = 1.0 if b == np.inf else Phi(b)
            num = pa - pb          # integral of x*phi(x) over [a, b]
            den = Pb - Pa          # integral of phi(x)  over [a, b]
            new_levels.append(num / den if den > 1e-10 else levels[i])
        levels = np.array(new_levels)
    return levels.astype(np.float32)


def hadamard_128() -> np.ndarray:
    """Sylvester Hadamard matrix of size 128 scaled by 2^(-7/2) (bf16-exact values),
    mirroring `hadamard_transform(torch.eye(128, dtype=bfloat16), scale=2**(-7/2))`."""
    H = np.array([[1.0]], dtype=np.float64)
    while H.shape[0] < 128:
        H = np.block([[H, H], [H, -H]])
    return (H * (2.0 ** (-7.0 / 2.0))).astype(np.float32)   # +-2^-3.5: exact in bf16


# -----------------------------------------------------------------------------
# Pallas kernel
# -----------------------------------------------------------------------------
def _quant_kernel(x_ref, had_ref, o_ref, *, boundaries, deltas, level0, use_abs):
    tm, H = x_ref.shape
    nblk = H // 128
    had = had_ref[...]                                    # (128,128) bf16, +-2^-3.5

    # Pass 1: per-128-lane-block Hadamard transform (MXU) + row sum of squares.
    # Static lane-aligned slices -> no reshape relayouts; bf16 operands, f32 acc.
    parts = []
    ssq = jnp.zeros((tm, 1), jnp.float32)
    for b in range(nblk):
        xb = x_ref[:, b * 128:(b + 1) * 128].astype(jnp.bfloat16)
        p = jnp.dot(xb, had, preferred_element_type=jnp.float32)   # (tm,128) f32
        parts.append(p)
        ssq = ssq + jnp.sum(p * p, axis=-1, keepdims=True)

    # Per-row RMS ("std"); eps placement identical to the reference module.
    std = jnp.sqrt(ssq * (1.0 / H)) + 1e-8                # (tm, 1)
    inv_std = 1.0 / std                                   # per-row only; exact

    # Pass 2: normalize once, boundary-scan against compile-time constant
    # thresholds (splat immediates, pure VALU), rescale, store lane-dense slices.
    # Strict '>' keeps torch.argmin's lower-index behaviour at exact midpoints
    # (for x<0 with the |.| trick the tie flips direction, but exact ties are
    # measure-zero in f32).
    for b in range(nblk):
        xn = parts[b] * inv_std                           # one bcast + one mul/elem
        a = jnp.abs(xn) if use_abs else xn
        q = jnp.full_like(a, level0)
        for bd, d in zip(boundaries, deltas):
            q = q + jnp.where(a > bd, d, 0.0)
        if use_abs:
            q = jnp.where(xn < 0.0, -q, q)                # restore sign (symmetric)
        # Forward value of grad_flow + (xq - grad_flow).detach() is exactly xq.
        o_ref[:, b * 128:(b + 1) * 128] = (q * std).astype(o_ref.dtype)


# -----------------------------------------------------------------------------
# Tiling / wrapper
# -----------------------------------------------------------------------------
def _round_up(v, m):
    return (v + m - 1) // m * m


def _cdiv(a, b):
    return -(-a // b)


def _pick_tiling(n_rows, H):
    """Row tile + VMEM limit.  The per-row budget includes in-kernel temporaries;
    the grid is split only when each step still moves enough bytes to amortize
    the ~0.35us per-step overhead (and feed both v7x TensorCores)."""
    per_row = 48 * H               # dbl-buffered f32 in/out (16H) + f32/bf16 temps
    try:
        vmem_cap = int(pltpu.get_tpu_info().vmem_capacity_bytes)
    except Exception:
        vmem_cap = 64 << 20        # v7x per-core floor; v5e/v6e have 128 MiB
    budget = max(2 << 20, min(vmem_cap // 2, 48 << 20))
    cap = min(4096, max(8, (budget // per_row) // 8 * 8))
    tm = min(cap, _round_up(max(n_rows, 1), 8))
    # >=4 grid steps only when each step keeps >= ~2 MiB of I/O.
    min_rows = max(8, _round_up(_cdiv(2 << 20, 8 * H), 8))
    if _round_up(n_rows, 8) >= 4 * min_rows:
        tm = min(tm, max(min_rows, _round_up(_cdiv(n_rows, 4), 8)))
    vmem_limit = int(min(vmem_cap * 7 // 8,
                         max(32 << 20, 2 * tm * per_row + (4 << 20))))
    return tm, vmem_limit


def half_hadamard_gaussian_trust_quantize(x, had_block, levels, *, tm=None):
    """x: (..., H), H a multiple of 128, float32 or bfloat16.  Same shape/dtype out."""
    orig_shape = x.shape
    H = int(orig_shape[-1])
    assert H % 128 == 0, "last dim must be a multiple of 128"
    R = int(np.prod(orig_shape[:-1], dtype=np.int64)) if len(orig_shape) > 1 else 1

    picked_tm, vmem_limit = _pick_tiling(R, H)
    if tm is None:
        tm = picked_tm
    assert tm % 8 == 0, "row tile must be a multiple of 8"

    # Pad rows to a multiple of the tile (zero rows quantize to tiny finite values
    # and are sliced away) -> handles any row count without VMEM-busting tiles.
    R_pad = _round_up(max(R, 1), tm)
    x2d = x.reshape(R, H)
    if R_pad != R:
        x2d = jnp.pad(x2d, ((0, R_pad - R), (0, 0)))

    had_bf16 = jnp.asarray(had_block, dtype=jnp.bfloat16)   # +-2^-3.5: bf16-exact

    # Compile-time quantizer constants.  The Gaussian Lloyd-Max levels are
    # symmetric, so scan |x_norm| against the positive half only (7 boundaries).
    lv = np.asarray(levels, dtype=np.float64)
    n = lv.size
    use_abs = (n % 2 == 0) and bool(np.allclose(lv, -lv[::-1], atol=1e-6))
    if use_abs:
        pos = lv[n // 2:]
        boundaries = tuple(float(v) for v in (pos[1:] + pos[:-1]) / 2.0)
        deltas = tuple(float(v) for v in (pos[1:] - pos[:-1]))
        level0 = float(pos[0])
    else:  # fallback: full scan over all n-1 boundaries
        boundaries = tuple(float(v) for v in (lv[1:] + lv[:-1]) / 2.0)
        deltas = tuple(float(v) for v in (lv[1:] - lv[:-1]))
        level0 = float(lv[0])

    kernel = partial(_quant_kernel, boundaries=boundaries, deltas=deltas,
                     level0=level0, use_abs=use_abs)

    itemsize = jnp.dtype(x.dtype).itemsize
    cost = pl.CostEstimate(
        flops=2 * R_pad * H * 128 + 30 * R_pad * H,      # Hadamard matmul + scan
        transcendentals=2 * R_pad,                       # sqrt + reciprocal per row
        bytes_accessed=2 * R_pad * H * itemsize + 128 * 128 * 2,
    )

    out = pl.pallas_call(
        kernel,
        out_shape=jax.ShapeDtypeStruct((R_pad, H), x.dtype),
        grid_spec=pltpu.PrefetchScalarGridSpec(
            num_scalar_prefetch=0,
            grid=(R_pad // tm,),
            in_specs=[
                pl.BlockSpec((tm, H), lambda i: (i, 0)),      # row tile of x
                pl.BlockSpec((128, 128), lambda i: (0, 0)),   # shared Hadamard block
            ],
            out_specs=pl.BlockSpec((tm, H), lambda i: (i, 0)),
        ),
        compiler_params=pltpu.CompilerParams(
            dimension_semantics=("parallel",),
            vmem_limit_bytes=vmem_limit,
        ),
        cost_estimate=cost,
    )(x2d, had_bf16)

    if R_pad != R:
        out = out[:R]
    return out.reshape(orig_shape)


# -----------------------------------------------------------------------------
# Pure-JAX references (same math, no Pallas) for a sanity check
# -----------------------------------------------------------------------------
def reference_forward(x, had_block, levels, *, bf16_matmul):
    shp = x.shape
    x2 = x.reshape(-1, 128)
    if bf16_matmul:
        xh = jnp.dot(x2.astype(jnp.bfloat16), had_block.astype(jnp.bfloat16),
                     preferred_element_type=jnp.float32)
    else:
        xh = jnp.dot(x2, had_block, preferred_element_type=jnp.float32,
                     precision=jax.lax.Precision.HIGHEST)
    x_had = xh.reshape(shp)
    std = jnp.sqrt(jnp.mean(x_had ** 2, axis=-1, keepdims=True)) + 1e-8
    x_norm = x_had / std
    idx = jnp.argmin(jnp.abs(x_norm[..., None] - levels), axis=-1)
    return levels[idx] * std


if __name__ == "__main__":
    bits = 4
    B, S, H = 2, 8, 256                # H must be a multiple of 128
    levels_np = compute_gaussian_levels(bits)
    had_np = hadamard_128()

    key = jax.random.PRNGKey(0)
    x = jax.random.normal(key, (B, S, H), dtype=jnp.float32)
    had = jnp.asarray(had_np)
    levels = jnp.asarray(levels_np)

    out = half_hadamard_gaussian_trust_quantize(x, had_np, levels_np)
    out = jax.block_until_ready(out)

    ref_f32 = jax.block_until_ready(reference_forward(x, had, levels, bf16_matmul=False))
    ref_b16 = jax.block_until_ready(reference_forward(x, had, levels, bf16_matmul=True))

    out_np = np.asarray(out)
    assert out.shape == x.shape and out.dtype == x.dtype
    assert np.all(np.isfinite(out_np))

    # Precision-matched reference (bf16 MXU inputs, f32 accumulation): should agree
    # except for vanishingly rare reduction-order / 1-ulp boundary ties.
    frac_matched = float(np.mean(np.abs(out_np - np.asarray(ref_b16)) > 1e-2))
    assert frac_matched < 0.002, f"mismatch vs precision-matched ref: {frac_matched}"

    # Spec-faithful f32 reference: allow rare quantization-level flips from bf16
    # MXU input rounding (near-boundary elements).
    frac_f32 = float(np.mean(np.abs(out_np - np.asarray(ref_f32)) > 1e-2))
    assert frac_f32 < 0.02, f"mismatch vs f32 ref too high: {frac_f32}"

    print("KERNEL_OK")
</pallas_src>

<mosaic_0001>
module attributes {stable_mosaic.version = 11 : i64} {
  func.func @_quant_kernel(%arg0: i32, %arg1: memref<16x256xf32, #tpu.memory_space<vmem>>, %arg2: memref<128x128xbf16, #tpu.memory_space<vmem>>, %arg3: memref<16x256xf32, #tpu.memory_space<vmem>>) attributes {dimension_semantics = [#tpu.dimension_semantics<parallel>], iteration_bounds = array<i64: 1>, scalar_prefetch = 0 : i64, scratch_operands = 0 : i64, tpu.core_type = #tpu.core_type<tc>, window_params = [{transform_indices = @transform_0, window_bounds = array<i64: 16, 256>}, {pipeline_mode = #tpu.pipeline_mode<synchronous>, transform_indices = @transform_1, window_bounds = array<i64: 128, 128>}, {transform_indices = @transform_2, window_bounds = array<i64: 16, 256>}]} {
    %c0 = arith.constant 0 : index
    %c0_0 = arith.constant 0 : index
    %0 = vector.load %arg2[%c0, %c0_0] : memref<128x128xbf16, #tpu.memory_space<vmem>>, vector<128x128xbf16>
    %cst = arith.constant 0.000000e+00 : f32
    %1 = vector.broadcast %cst : f32 to vector<16x1xf32>
    %c0_1 = arith.constant 0 : index
    %c0_2 = arith.constant 0 : index
    %2 = vector.load %arg1[%c0_1, %c0_2] : memref<16x256xf32, #tpu.memory_space<vmem>>, vector<16x128xf32>
    %3 = arith.truncf %2 : vector<16x128xf32> to vector<16x128xbf16>
    %cst_3 = arith.constant dense<0.000000e+00> : vector<16x128xf32>
    %4 = tpu.matmul %3, %0, %cst_3 {dimension_numbers = #tpu.dot_dimension_numbers<[1], [0], [0], [1], [0, 0, 1, 1], [], []>} : vector<16x128xbf16>, vector<128x128xbf16>, vector<16x128xf32> -> vector<16x128xf32>
    %5 = arith.mulf %4, %4 : vector<16x128xf32>
    %cst_4 = arith.constant dense<0.000000e+00> : vector<16xf32>
    %6 = vector.multi_reduction <add>, %5, %cst_4 [1] : vector<16x128xf32> to vector<16xf32>
    %7 = vector.shape_cast %6 : vector<16xf32> to vector<16x1xf32>
    %8 = arith.addf %1, %7 : vector<16x1xf32>
    %c0_5 = arith.constant 0 : index
    %c128 = arith.constant 128 : index
    %9 = vector.load %arg1[%c0_5, %c128] : memref<16x256xf32, #tpu.memory_space<vmem>>, vector<16x128xf32>
    %10 = arith.truncf %9 : vector<16x128xf32> to vector<16x128xbf16>
    %cst_6 = arith.constant dense<0.000000e+00> : vector<16x128xf32>
    %11 = tpu.matmul %10, %0, %cst_6 {dimension_numbers = #tpu.dot_dimension_numbers<[1], [0], [0], [1], [0, 0, 1, 1], [], []>} : vector<16x128xbf16>, vector<128x128xbf16>, vector<16x128xf32> -> vector<16x128xf32>
    %12 = arith.mulf %11, %11 : vector<16x128xf32>
    %cst_7 = arith.constant dense<0.000000e+00> : vector<16xf32>
    %13 = vector.multi_reduction <add>, %12, %cst_7 [1] : vector<16x128xf32> to vector<16xf32>
    %14 = vector.shape_cast %13 : vector<16xf32> to vector<16x1xf32>
    %15 = arith.addf %8, %14 : vector<16x1xf32>
    %cst_8 = arith.constant 3.906250e-03 : f32
    %16 = vector.broadcast %cst_8 : f32 to vector<16x1xf32>
    %17 = arith.mulf %15, %16 : vector<16x1xf32>
    %18 = math.sqrt %17 : vector<16x1xf32>
    %cst_9 = arith.constant 9.99999993E-9 : f32
    %19 = vector.broadcast %cst_9 : f32 to vector<16x1xf32>
    %20 = arith.addf %18, %19 : vector<16x1xf32>
    %cst_10 = arith.constant 1.000000e+00 : f32
    %21 = vector.broadcast %cst_10 : f32 to vector<16x1xf32>
    %22 = arith.divf %21, %20 : vector<16x1xf32>
    %23 = vector.broadcast %22 : vector<16x1xf32> to vector<16x128xf32>
    %24 = arith.mulf %4, %23 : vector<16x128xf32>
    %25 = math.absf %24 : vector<16x128xf32>
    %cst_11 = arith.constant 0.162266552 : f32
    %26 = vector.broadcast %cst_11 : f32 to vector<16x128xf32>
    %cst_12 = arith.constant 0.324961722 : f32
    %27 = vector.broadcast %cst_12 : f32 to vector<16x128xf32>
    %28 = arith.cmpf ogt, %25, %27 : vector<16x128xf32>
    %cst_13 = arith.constant 0.325390309 : f32
    %cst_14 = arith.constant 0.000000e+00 : f32
    %29 = vector.broadcast %cst_13 : f32 to vector<16x128xf32>
    %30 = vector.broadcast %cst_14 : f32 to vector<16x128xf32>
    %31 = arith.select %28, %29, %30 : vector<16x128xi1>, vector<16x128xf32>
    %32 = arith.addf %26, %31 : vector<16x128xf32>
    %cst_15 = arith.constant 0.651883364 : f32
    %33 = vector.broadcast %cst_15 : f32 to vector<16x128xf32>
    %34 = arith.cmpf ogt, %25, %33 : vector<16x128xf32>
    %cst_16 = arith.constant 0.328452975 : f32
    %cst_17 = arith.constant 0.000000e+00 : f32
    %35 = vector.broadcast %cst_16 : f32 to vector<16x128xf32>
    %36 = vector.broadcast %cst_17 : f32 to vector<16x128xf32>
    %37 = arith.select %34, %35, %36 : vector<16x128xi1>, vector<16x128xf32>
    %38 = arith.addf %32, %37 : vector<16x128xf32>
    %cst_18 = arith.constant 0.983825087 : f32
    %39 = vector.broadcast %cst_18 : f32 to vector<16x128xf32>
    %40 = arith.cmpf ogt, %25, %39 : vector<16x128xf32>
    %cst_19 = arith.constant 0.335430562 : f32
    %cst_20 = arith.constant 0.000000e+00 : f32
    %41 = vector.broadcast %cst_19 : f32 to vector<16x128xf32>
    %42 = vector.broadcast %cst_20 : f32 to vector<16x128xf32>
    %43 = arith.select %40, %41, %42 : vector<16x128xi1>, vector<16x128xf32>
    %44 = arith.addf %38, %43 : vector<16x128xf32>
    %cst_21 = arith.constant 1.32661653 : f32
    %45 = vector.broadcast %cst_21 : f32 to vector<16x128xf32>
    %46 = arith.cmpf ogt, %25, %45 : vector<16x128xf32>
    %cst_22 = arith.constant 0.350152373 : f32
    %cst_23 = arith.constant 0.000000e+00 : f32
    %47 = vector.broadcast %cst_22 : f32 to vector<16x128xf32>
    %48 = vector.broadcast %cst_23 : f32 to vector<16x128xf32>
    %49 = arith.select %46, %47, %48 : vector<16x128xi1>, vector<16x128xf32>
    %50 = arith.addf %44, %49 : vector<16x128xf32>
    %cst_24 = arith.constant 1.69224644 : f32
    %51 = vector.broadcast %cst_24 : f32 to vector<16x128xf32>
    %52 = arith.cmpf ogt, %25, %51 : vector<16x128xf32>
    %cst_25 = arith.constant 0.381107211 : f32
    %cst_26 = arith.constant 0.000000e+00 : f32
    %53 = vector.broadcast %cst_25 : f32 to vector<16x128xf32>
    %54 = vector.broadcast %cst_26 : f32 to vector<16x128xf32>
    %55 = arith.select %52, %53, %54 : vector<16x128xi1>, vector<16x128xf32>
    %56 = arith.addf %50, %55 : vector<16x128xf32>
    %cst_27 = arith.constant 2.1078198 : f32
    %57 = vector.broadcast %cst_27 : f32 to vector<16x128xf32>
    %58 = arith.cmpf ogt, %25, %57 : vector<16x128xf32>
    %cst_28 = arith.constant 0.450039506 : f32
    %cst_29 = arith.constant 0.000000e+00 : f32
    %59 = vector.broadcast %cst_28 : f32 to vector<16x128xf32>
    %60 = vector.broadcast %cst_29 : f32 to vector<16x128xf32>
    %61 = arith.select %58, %59, %60 : vector<16x128xi1>, vector<16x128xf32>
    %62 = arith.addf %56, %61 : vector<16x128xf32>
    %cst_30 = arith.constant 2.65141606 : f32
    %63 = vector.broadcast %cst_30 : f32 to vector<16x128xf32>
    %64 = arith.cmpf ogt, %25, %63 : vector<16x128xf32>
    %cst_31 = arith.constant 0.637153148 : f32
    %cst_32 = arith.constant 0.000000e+00 : f32
    %65 = vector.broadcast %cst_31 : f32 to vector<16x128xf32>
    %66 = vector.broadcast %cst_32 : f32 to vector<16x128xf32>
    %67 = arith.select %64, %65, %66 : vector<16x128xi1>, vector<16x128xf32>
    %68 = arith.addf %62, %67 : vector<16x128xf32>
    %cst_33 = arith.constant 0.000000e+00 : f32
    %69 = vector.broadcast %cst_33 : f32 to vector<16x128xf32>
    %70 = arith.cmpf olt, %24, %69 : vector<16x128xf32>
    %cst_34 = arith.constant 0.000000e+00 : f32
    %71 = vector.broadcast %cst_34 : f32 to vector<16x128xf32>
    %72 = arith.subf %71, %68 : vector<16x128xf32>
    %73 = arith.select %70, %72, %68 : vector<16x128xi1>, vector<16x128xf32>
    %74 = vector.broadcast %20 : vector<16x1xf32> to vector<16x128xf32>
    %75 = arith.mulf %73, %74 : vector<16x128xf32>
    %c0_35 = arith.constant 0 : index
    %c0_36 = arith.constant 0 : index
    %76 = vector.load %arg3[%c0_35, %c0_36] : memref<16x256xf32, #tpu.memory_space<vmem>>, vector<16x128xf32>
    tpu.vector_store %arg3[%c0_35, %c0_36], %75 {strides = array<i32>} : memref<16x256xf32, #tpu.memory_space<vmem>>, vector<16x128xf32>,
    %77 = vector.broadcast %22 : vector<16x1xf32> to vector<16x128xf32>
    %78 = arith.mulf %11, %77 : vector<16x128xf32>
    %79 = math.absf %78 : vector<16x128xf32>
    %cst_37 = arith.constant 0.162266552 : f32
    %80 = vector.broadcast %cst_37 : f32 to vector<16x128xf32>
    %cst_38 = arith.constant 0.324961722 : f32
    %81 = vector.broadcast %cst_38 : f32 to vector<16x128xf32>
    %82 = arith.cmpf ogt, %79, %81 : vector<16x128xf32>
    %cst_39 = arith.constant 0.325390309 : f32
    %cst_40 = arith.constant 0.000000e+00 : f32
    %83 = vector.broadcast %cst_39 : f32 to vector<16x128xf32>
    %84 = vector.broadcast %cst_40 : f32 to vector<16x128xf32>
    %85 = arith.select %82, %83, %84 : vector<16x128xi1>, vector<16x128xf32>
    %86 = arith.addf %80, %85 : vector<16x128xf32>
    %cst_41 = arith.constant 0.651883364 : f32
    %87 = vector.broadcast %cst_41 : f32 to vector<16x128xf32>
    %88 = arith.cmpf ogt, %79, %87 : vector<16x128xf32>
    %cst_42 = arith.constant 0.328452975 : f32
    %cst_43 = arith.constant 0.000000e+00 : f32
    %89 = vector.broadcast %cst_42 : f32 to vector<16x128xf32>
    %90 = vector.broadcast %cst_43 : f32 to vector<16x128xf32>
    %91 = arith.select %88, %89, %90 : vector<16x128xi1>, vector<16x128xf32>
    %92 = arith.addf %86, %91 : vector<16x128xf32>
    %cst_44 = arith.constant 0.983825087 : f32
    %93 = vector.broadcast %cst_44 : f32 to vector<16x128xf32>
    %94 = arith.cmpf ogt, %79, %93 : vector<16x128xf32>
    %cst_45 = arith.constant 0.335430562 : f32
    %cst_46 = arith.constant 0.000000e+00 : f32
    %95 = vector.broadcast %cst_45 : f32 to vector<16x128xf32>
    %96 = vector.broadcast %cst_46 : f32 to vector<16x128xf32>
    %97 = arith.select %94, %95, %96 : vector<16x128xi1>, vector<16x128xf32>
    %98 = arith.addf %92, %97 : vector<16x128xf32>
    %cst_47 = arith.constant 1.32661653 : f32
    %99 = vector.broadcast %cst_47 : f32 to vector<16x128xf32>
    %100 = arith.cmpf ogt, %79, %99 : vector<16x128xf32>
    %cst_48 = arith.constant 0.350152373 : f32
    %cst_49 = arith.constant 0.000000e+00 : f32
    %101 = vector.broadcast %cst_48 : f32 to vector<16x128xf32>
    %102 = vector.broadcast %cst_49 : f32 to vector<16x128xf32>
    %103 = arith.select %100, %101, %102 : vector<16x128xi1>, vector<16x128xf32>
    %104 = arith.addf %98, %103 : vector<16x128xf32>
    %cst_50 = arith.constant 1.69224644 : f32
    %105 = vector.broadcast %cst_50 : f32 to vector<16x128xf32>
    %106 = arith.cmpf ogt, %79, %105 : vector<16x128xf32>
    %cst_51 = arith.constant 0.381107211 : f32
    %cst_52 = arith.constant 0.000000e+00 : f32
    %107 = vector.broadcast %cst_51 : f32 to vector<16x128xf32>
    %108 = vector.broadcast %cst_52 : f32 to vector<16x128xf32>
    %109 = arith.select %106, %107, %108 : vector<16x128xi1>, vector<16x128xf32>
    %110 = arith.addf %104, %109 : vector<16x128xf32>
    %cst_53 = arith.constant 2.1078198 : f32
    %111 = vector.broadcast %cst_53 : f32 to vector<16x128xf32>
    %112 = arith.cmpf ogt, %79, %111 : vector<16x128xf32>
    %cst_54 = arith.constant 0.450039506 : f32
    %cst_55 = arith.constant 0.000000e+00 : f32
    %113 = vector.broadcast %cst_54 : f32 to vector<16x128xf32>
    %114 = vector.broadcast %cst_55 : f32 to vector<16x128xf32>
    %115 = arith.select %112, %113, %114 : vector<16x128xi1>, vector<16x128xf32>
    %116 = arith.addf %110, %115 : vector<16x128xf32>
    %cst_56 = arith.constant 2.65141606 : f32
    %117 = vector.broadcast %cst_56 : f32 to vector<16x128xf32>
    %118 = arith.cmpf ogt, %79, %117 : vector<16x128xf32>
    %cst_57 = arith.constant 0.637153148 : f32
    %cst_58 = arith.constant 0.000000e+00 : f32
    %119 = vector.broadcast %cst_57 : f32 to vector<16x128xf32>
    %120 = vector.broadcast %cst_58 : f32 to vector<16x128xf32>
    %121 = arith.select %118, %119, %120 : vector<16x128xi1>, vector<16x128xf32>
    %122 = arith.addf %116, %121 : vector<16x128xf32>
    %cst_59 = arith.constant 0.000000e+00 : f32
    %123 = vector.broadcast %cst_59 : f32 to vector<16x128xf32>
    %124 = arith.cmpf olt, %78, %123 : vector<16x128xf32>
    %cst_60 = arith.constant 0.000000e+00 : f32
    %125 = vector.broadcast %cst_60 : f32 to vector<16x128xf32>
    %126 = arith.subf %125, %122 : vector<16x128xf32>
    %127 = arith.select %124, %126, %122 : vector<16x128xi1>, vector<16x128xf32>
    %128 = vector.broadcast %20 : vector<16x1xf32> to vector<16x128xf32>
    %129 = arith.mulf %127, %128 : vector<16x128xf32>
    %c0_61 = arith.constant 0 : index
    %c128_62 = arith.constant 128 : index
    %130 = vector.load %arg3[%c0_61, %c128_62] : memref<16x256xf32, #tpu.memory_space<vmem>>, vector<16x128xf32>
    tpu.vector_store %arg3[%c0_61, %c128_62], %129 {strides = array<i32>} : memref<16x256xf32, #tpu.memory_space<vmem>>, vector<16x128xf32>,
    return
  }
  func.func @transform_0(%arg0: i32) -> (i32, i32) {
    %c0_i32 = arith.constant 0 : i32
    %c0_i32_0 = arith.constant 0 : i32
    return %arg0, %c0_i32 : i32, i32
  }
  func.func @transform_1(%arg0: i32) -> (i32, i32) {
    %c0_i32 = arith.constant 0 : i32
    %c0_i32_0 = arith.constant 0 : i32
    %c0_i32_1 = arith.constant 0 : i32
    return %c0_i32, %c0_i32_0 : i32, i32
  }
  func.func @transform_2(%arg0: i32) -> (i32, i32) {
    %c0_i32 = arith.constant 0 : i32
    %c0_i32_0 = arith.constant 0 : i32
    return %arg0, %c0_i32 : i32, i32
  }
}

</mosaic_0001>

<bundles_post_ra>
// kernel: tpu_custom_call.1
= control target key start
LH: loop header
LB: loop body
LE: loop exit
PB: predicated region body
PF: predicated region fallthrough
CT: control target
= control target key end

     0   :  { %7 = vsyncpa [#allocation3], 0  ;;  %s678_s0 = inlined_call_operand.hbm [shape: f32[16,256], index: 0, kind: input, shape index: {}]   ;;  %s679_s1 = inlined_call_operand.hbm [shape: bf16[128,128], index: 1, kind: input, shape index: {}]   ;;  %s680_s2 = inlined_call_operand.hbm [shape: f32[16,256], index: 2, kind: output, shape index: {}]  }
   0x1   :  { %8 = vsyncpa [#allocation6], 0 }
   0x2   :  { %9 = vsyncpa [#allocation4], 0  ;;  %s524_s9 = smov [#allocation2]   ;;  %s452_s13 = scalar_lea.hbm %s678_s0, 512 }
   0x3   :  { %s15_s10 = sshll.u32 %s524_s9, 4  ;;  %p453_p0 = scmp.ne.s32.totalorder %s678_s0, %s452_s13  ;;  %s16_s10 = int_to_ptr.vmem [resolvable:$true] %s15_s10 }
   0x4   :  { %p456_p1 = scmp.lt.u32.totalorder %s452_s13, %s678_s0 }
   0x6   :  { %p458_p2 = pnand %p456_p1, %p453_p0 }
   0x8   :  { %461 = shalt.err (!%p458_p2)
}
   0x9   :  { %s462_s18 = scalar_lea.vmem %s16_s10, 512  ;;  %p467_p4 = scmp.lt.s32.totalorder %s16_s10, %s16_s10 }
   0xa   :  { %p463_p3 = scmp.ne.s32.totalorder %s16_s10, %s462_s18  ;;  %p468_p5 = scmp.lt.s32.totalorder %s462_s18, %s462_s18 }
   0xc   :  { %p469_p6 = por %p468_p5, %p467_p4 }
   0xe   :  { %p470_p7 = pnand %p469_p6, %p463_p3 }
  0x10   :  { %473 = shalt.err (!%p470_p7)
}
  0x11   :  { %s525_s19 = smov 256   ;;  %s526_s20 = smov 16  }
  0x12   :  { %21 = dma.hbm_to_vmem [thread:$0]  %s678_s0, 512, %s16_s10, [#allocation3], %s525_s19, %s525_s19, %s526_s20  }
  0x13   :  { %s527_s23 = smov [#allocation5]   ;;  %s474_s27 = scalar_lea.hbm %s679_s1, 1024 }
  0x14   :  { %s27_s24 = sshll.u32 %s527_s23, 4  ;;  %p475_p8 = scmp.ne.s32.totalorder %s679_s1, %s474_s27  ;;  %s28_s24 = int_to_ptr.vmem [resolvable:$true] %s27_s24 }
  0x15   :  { %p478_p9 = scmp.lt.u32.totalorder %s474_s27, %s679_s1 }
  0x17   :  { %p480_p10 = pnand %p478_p9, %p475_p8 }
  0x19   :  { %483 = shalt.err (!%p480_p10)
}
  0x1a   :  { %s484_s4 = scalar_lea.vmem %s28_s24, 1024  ;;  %p489_p12 = scmp.lt.s32.totalorder %s28_s24, %s28_s24 }
  0x1b   :  { %p485_p11 = scmp.ne.s32.totalorder %s28_s24, %s484_s4  ;;  %p490_p13 = scmp.lt.s32.totalorder %s484_s4, %s484_s4 }
  0x1d   :  { %p491_p0 = por %p490_p13, %p489_p12 }
  0x1f   :  { %p492_p1 = pnand %p491_p0, %p485_p11 }
  0x21   :  { %495 = shalt.err (!%p492_p1)
}
  0x22   :  { %s528_s0 = smov 64   ;;  %s529_s5 = smov 4  }
  0x23   :  { %33 = dma.hbm_to_vmem [thread:$0]  %s679_s1, 1024, %s28_s24, [#allocation6], %s528_s0, %s528_s0, %s529_s5  }
  0x24   :  { %518 = dma.done.wait [#allocation3], 512  }
  0x25   :  { %519 = vsyncadd [#allocation3], 4294966784 }
  0x26   :  { %520 = dma.done.wait [#allocation6], 1024  }
  0x27   :  { %521 = vsyncadd [#allocation6], 4294966272  ;;  %v530_v0 = vmov 0.0   ;;  %vm531_vm0 = vmmov 0   ;;  %v436_v1 = vld [vmem:[#allocation5] sm:$0xff]   ;;  %v437_v2 = vld [vmem:[#allocation5 + $0x8] sm:$0xff]  }
  0x28   :  { %387 = vmatprep.subr.bf16.mxu0 %v530_v0  ;;  %407 = vmatprep.subr.bf16.mxu1 %v530_v0  ;;  %v438_v3 = vld [vmem:[#allocation5 + $0x10] sm:$0xff]   ;;  %v439_v4 = vld [vmem:[#allocation5 + $0x18] sm:$0xff]   ;;  %v440_v5 = vld [vmem:[#allocation5 + $0x20] sm:$0xff]   ;;  %s532_s1 = smov [#allocation7]  }
  0x29   :  { %403 = vmatprep.mubr.msk.bf16.mxu0 %vm531_vm0, %v530_v0  ;;  %423 = vmatprep.mubr.msk.bf16.mxu1 %vm531_vm0, %v530_v0  ;;  %v441_v6 = vld [vmem:[#allocation5 + $0x28] sm:$0xff]   ;;  %v442_v7 = vld [vmem:[#allocation5 + $0x30] sm:$0xff]   ;;  %v443_v8 = vld [vmem:[#allocation5 + $0x38] sm:$0xff]   ;;  %s348_s8 = sshll.u32 %s532_s1, 4  ;;  %s349_s8 = int_to_ptr.vmem [resolvable:$true] %s348_s8 }
  0x2a   :  { %388 = vmatpush3.bf16.msra.mxu0 %v436_v1  ;;  %408 = vmatpush3.bf16.msra.mxu1 %v436_v1  ;;  %v57_v9 = vld [vmem:[#allocation2] sm:$0xff]  ;;  %v58_v10 = vld [vmem:[#allocation2 + $0x10] sm:$0xff]  ;;  %v157_v11 = vld [vmem:[#allocation2 + $0x8] sm:$0xff]  ;;  %s496_s9 = scalar_lea.vmem %s349_s8, 512  ;;  %p501_p3 = scmp.lt.s32.totalorder %s349_s8, %s349_s8 }
  0x2b   :  { %389 = vmatprep.subr.bf16.mxu0 %v530_v0  ;;  %409 = vmatprep.subr.bf16.mxu1 %v530_v0  ;;  %v158_v12 = vld [vmem:[#allocation2 + $0x18] sm:$0xff]  ;;  %v59_v13 = vpack.c.bf16 %v58_v10, %v57_v9  ;;  %p497_p2 = scmp.ne.s32.totalorder %s349_s8, %s496_s9  ;;  %p502_p4 = scmp.lt.s32.totalorder %s496_s9, %s496_s9 }
  0x2c   :  { %v159_v14 = vpack.c.bf16 %v158_v12, %v157_v11 }
  0x2d   :  { %p503_p5 = por %p502_p4, %p501_p3 }
  0x2e   :  { %390 = vmatpush3.bf16.msra.mxu0 %v437_v2  ;;  %410 = vmatpush3.bf16.msra.mxu1 %v437_v2 }
  0x2f   :  { %391 = vmatprep.subr.bf16.mxu0 %v530_v0  ;;  %411 = vmatprep.subr.bf16.mxu1 %v530_v0  ;;  %p504_p6 = pnand %p503_p5, %p497_p2 }
  0x32   :  { %392 = vmatpush3.bf16.msra.mxu0 %v438_v3  ;;  %412 = vmatpush3.bf16.msra.mxu1 %v438_v3 }
  0x33   :  { %393 = vmatprep.subr.bf16.mxu0 %v530_v0  ;;  %413 = vmatprep.subr.bf16.mxu1 %v530_v0 }
  0x36   :  { %394 = vmatpush3.bf16.msra.mxu0 %v439_v4  ;;  %414 = vmatpush3.bf16.msra.mxu1 %v439_v4 }
  0x37   :  { %395 = vmatprep.subr.bf16.mxu0 %v530_v0  ;;  %415 = vmatprep.subr.bf16.mxu1 %v530_v0 }
  0x3a   :  { %396 = vmatpush3.bf16.msra.mxu0 %v440_v5  ;;  %416 = vmatpush3.bf16.msra.mxu1 %v440_v5 }
  0x3b   :  { %397 = vmatprep.subr.bf16.mxu0 %v530_v0  ;;  %417 = vmatprep.subr.bf16.mxu1 %v530_v0 }
  0x3e   :  { %398 = vmatpush3.bf16.msra.mxu0 %v441_v6  ;;  %418 = vmatpush3.bf16.msra.mxu1 %v441_v6 }
  0x3f   :  { %399 = vmatprep.subr.bf16.mxu0 %v530_v0  ;;  %419 = vmatprep.subr.bf16.mxu1 %v530_v0 }
  0x42   :  { %400 = vmatpush3.bf16.msra.mxu0 %v442_v7  ;;  %420 = vmatpush3.bf16.msra.mxu1 %v442_v7 }
  0x43   :  { %401 = vmatprep.subr.bf16.mxu0 %v530_v0  ;;  %421 = vmatprep.subr.bf16.mxu1 %v530_v0 }
  0x46   :  { %402 = vmatpush3.bf16.msra.mxu0 %v443_v8  ;;  %422 = vmatpush3.bf16.msra.mxu1 %v443_v8 }
  0x49   :  { %404 = vmatmul.mubr.bf16.vlgmr.msra.gmra.mrb[0].mxu0 %v59_v13  ;;  %424 = vmatmul.mubr.bf16.vlgmr.msra.gmra.mrb[0].mxu1 %v159_v14 }
 0x11c   :  { %v142_v15 = vpop.f32.mrb[0].mxu0  ;;  %v194_v16 = vpop.f32.mrb[0].mxu1 }
 0x11d   :  { %v405_v17 = vpop.f32.mrb[1].mxu0  ;;  %v425_v18 = vpop.f32.mrb[1].mxu1  ;;  %v201_v19 = vmul.f32 %v194_v16, %v194_v16  ;;  %v149_v20 = vmul.f32 %v142_v15, %v142_v15 }
 0x11e   :  { %v145_v21 = vpop.f32.mrb[2].mxu0  ;;  %v593_v22 = vpop.f32.mrb[2].mxu1 }
 0x11f   :  { %203 = vadd.xlane.f32.xlu1 %v201_v19  ;;  %v426_v23 = vpop.f32.mrb[3].mxu1  ;;  %151 = vadd.xlane.f32.xlu0 %v149_v20  ;;  %v406_v24 = vpop.f32.mrb[3].mxu0  ;;  %v202_v25 = vmul.f32 %v593_v22, %v593_v22  ;;  %v150_v26 = vmul.f32 %v145_v21, %v145_v21 }
 0x123   :  { %205 = vadd.xlane.f32.xlu1 %v202_v25  ;;  %153 = vadd.xlane.f32.xlu0 %v150_v26 }
 0x1ac   :  { %v204_v27 = vpop.xlane.xlu1 %203  ;;  %v152_v28 = vpop.xlane.xlu0 %151 }
 0x1ad   :  { %v207_v29 = vadd.f32 %v204_v27, %v152_v28 }
 0x1af   :  { %v209_v30 = vmul.f32 0.00390625, %v207_v29 }
 0x1b0   :  { %v206_v31 = vpop.xlane.xlu1 %205  ;;  %v154_v32 = vpop.xlane.xlu0 %153 }
 0x1b1   :  { %444 = vrsqrt.f32 %v209_v30  ;;  %v208_v33 = vadd.f32 %v206_v31, %v154_v32  ;;  %vm213_vm1 = vcmp.eq.f32.partialorder %v209_v30, inf  ;;  %v216_v37 = vand.u32 2147483648, %v209_v30 }
 0x1b2   :  { %vm215_vm2 = vcmp.eq.f32.partialorder %v209_v30, 0.0 }
 0x1b3   :  { %v210_v34 = vmul.f32 0.00390625, %v208_v33 }
 0x1b5   :  { %446 = vrsqrt.f32 %v210_v34  ;;  %vm220_vm3 = vcmp.eq.f32.partialorder %v210_v34, inf  ;;  %v223_v43 = vand.u32 2147483648, %v210_v34  ;;  %vm222_vm4 = vcmp.eq.f32.partialorder %v210_v34, 0.0 }
 0x1bb   :  { %v445_v35 = vpop.eup %444 }
 0x1bc   :  { %v212_v36 = vmul.f32 %v445_v35, %v209_v30 }
 0x1be   :  { %v214_v38 = vsel %vm213_vm1, %v209_v30, %v212_v36 }
 0x1bf   :  { %v447_v39 = vpop.eup %446  ;;  %v217_v40 = vsel %vm215_vm2, %v216_v37, %v214_v38 }
 0x1c0   :  { %v219_v41 = vmul.f32 %v447_v39, %v210_v34  ;;  %v597_v42 = vadd.f32 1e-08, %v217_v40 }
 0x1c2   :  { %v221_v44 = vsel %vm220_vm3, %v210_v34, %v219_v41  ;;  %448 = vrcp.f32 %v597_v42 }
 0x1c3   :  { %v224_v45 = vsel %vm222_vm4, %v223_v43, %v221_v44 }
 0x1c4   :  { %v600_v46 = vadd.f32 1e-08, %v224_v45 }
 0x1c6   :  { %450 = vrcp.f32 %v600_v46 }
 0x1cc   :  { %v449_v47 = vpop.eup %448 }
 0x1cd   :  { %v603_v48 = vmul.f32 %v449_v47, %v142_v15  ;;  %v605_v49 = vmul.f32 %v449_v47, %v194_v16 }
 0x1cf   :  { %v233_v50 = vand.u32 2147483647, %v603_v48  ;;  %v613_v55 = vand.u32 2147483647, %v605_v49  ;;  %vm277_vm3 = vcmp.lt.f32.partialorder %v603_v48, 0.0 }
 0x1d0   :  { %v451_v51 = vpop.eup %450 }
 0x1d1   :  { %v608_v52 = vmul.f32 %v451_v51, %v145_v21  ;;  %vm235_vm5 = vcmp.gt.f32.partialorder %v233_v50, 0.32496172  ;;  %vm241_vm6 = vcmp.gt.f32.partialorder %v233_v50, 0.65188336  ;;  %vm247_vm7 = vcmp.gt.f32.partialorder %v233_v50, 0.9838251 }
 0x1d2   :  { %v237_v53 = vsel %vm235_vm5, 0.3253903, %v530_v0  ;;  %v243_v54 = vsel %vm241_vm6, 0.32845297, %v530_v0  ;;  %vm253_vm8 = vcmp.gt.f32.partialorder %v233_v50, 1.3266165  ;;  %v624_v5 = vmul.f32 %v451_v51, %v593_v22 }
 0x1d3   :  { %v234_v56 = vand.u32 2147483647, %v608_v52  ;;  %v239_v57 = vadd.f32 0.16226655, %v237_v53  ;;  %v249_v58 = vsel %vm247_vm7, 0.33543056, %v530_v0 }
 0x1d4   :  { %v255_v59 = vsel %vm253_vm8, 0.35015237, %v530_v0  ;;  %vm259_vm9 = vcmp.gt.f32.partialorder %v233_v50, 1.6922464  ;;  %vm265_vm13 = vcmp.gt.f32.partialorder %v233_v50, 2.1078198 }
 0x1d5   :  { %vm236_vm10 = vcmp.gt.f32.partialorder %v234_v56, 0.32496172  ;;  %vm242_vm11 = vcmp.gt.f32.partialorder %v234_v56, 0.65188336  ;;  %v245_v60 = vadd.f32 %v243_v54, %v239_v57  ;;  %vm248_vm12 = vcmp.gt.f32.partialorder %v234_v56, 0.9838251 }
 0x1d6   :  { %v238_v61 = vsel %vm236_vm10, 0.3253903, %v530_v0  ;;  %v244_v62 = vsel %vm242_vm11, 0.32845297, %v530_v0  ;;  %vm254_vm14 = vcmp.gt.f32.partialorder %v234_v56, 1.3266165 }
 0x1d7   :  { %v240_v63 = vadd.f32 0.16226655, %v238_v61  ;;  %v251_v1 = vadd.f32 %v249_v58, %v245_v60  ;;  %vm260_vm15 = vcmp.gt.f32.partialorder %v234_v56, 1.6922464  ;;  %v250_v2 = vsel %vm248_vm12, 0.33543056, %v530_v0 }
 0x1d8   :  { %v256_v3 = vsel %vm254_vm14, 0.35015237, %v530_v0  ;;  %v261_v4 = vsel %vm259_vm9, 0.3811072, %v530_v0  ;;  %v262_v8 = vsel %vm260_vm15, 0.3811072, %v530_v0 }
 0x1d9   :  { %v246_v6 = vadd.f32 %v244_v62, %v240_v63  ;;  %v257_v7 = vadd.f32 %v255_v59, %v251_v1  ;;  %vm266_vm0 = vcmp.gt.f32.partialorder %v234_v56, 2.1078198  ;;  %v267_v9 = vsel %vm265_vm13, 0.4500395, %v530_v0 }
 0x1da   :  { %vm271_vm1 = vcmp.gt.f32.partialorder %v233_v50, 2.651416  ;;  %vm272_vm2 = vcmp.gt.f32.partialorder %v234_v56, 2.651416  ;;  %v268_v12 = vsel %vm266_vm0, 0.4500395, %v530_v0 }
 0x1db   :  { %v252_v10 = vadd.f32 %v250_v2, %v246_v6  ;;  %v263_v11 = vadd.f32 %v261_v4, %v257_v7  ;;  %v273_v13 = vsel %vm271_vm1, 0.63715315, %v530_v0  ;;  %v274_v14 = vsel %vm272_vm2, 0.63715315, %v530_v0 }
 0x1dc   :  { %v290_v15 = vand.u32 2147483647, %v624_v5  ;;  %vm291_vm4 = vcmp.gt.f32.partialorder %v613_v55, 0.32496172  ;;  %vm297_vm5 = vcmp.gt.f32.partialorder %v613_v55, 0.65188336 }
 0x1dd   :  { %v258_v16 = vadd.f32 %v256_v3, %v252_v10  ;;  %v269_v17 = vadd.f32 %v267_v9, %v263_v11  ;;  %v293_v18 = vsel %vm291_vm4, 0.3253903, %v530_v0  ;;  %v299_v23 = vsel %vm297_vm5, 0.32845297, %v530_v0 }
 0x1de   :  { %vm292_vm6 = vcmp.gt.f32.partialorder %v290_v15, 0.32496172  ;;  %v295_v19 = vadd.f32 0.16226655, %v293_v18  ;;  %vm298_vm7 = vcmp.gt.f32.partialorder %v290_v15, 0.65188336 }
 0x1df   :  { %v264_v20 = vadd.f32 %v262_v8, %v258_v16  ;;  %v275_v21 = vadd.f32 %v273_v13, %v269_v17  ;;  %v294_v22 = vsel %vm292_vm6, 0.3253903, %v530_v0  ;;  %v300_v25 = vsel %vm298_vm7, 0.32845297, %v530_v0 }
 0x1e0   :  { %v296_v24 = vadd.f32 0.16226655, %v294_v22  ;;  %v301_v26 = vadd.f32 %v299_v23, %v295_v19  ;;  %vm303_vm8 = vcmp.gt.f32.partialorder %v613_v55, 0.9838251  ;;  %vm304_vm9 = vcmp.gt.f32.partialorder %v290_v15, 0.9838251 }
 0x1e1   :  { %v270_v27 = vadd.f32 %v268_v12, %v264_v20  ;;  %v279_v28 = vsub.f32 0.0, %v275_v21  ;;  %v305_v29 = vsel %vm303_vm8, 0.33543056, %v530_v0  ;;  %v306_v31 = vsel %vm304_vm9, 0.33543056, %v530_v0 }
 0x1e2   :  { %v302_v30 = vadd.f32 %v300_v25, %v296_v24  ;;  %v307_v32 = vadd.f32 %v305_v29, %v301_v26  ;;  %vm309_vm10 = vcmp.gt.f32.partialorder %v613_v55, 1.3266165  ;;  %vm310_vm11 = vcmp.gt.f32.partialorder %v290_v15, 1.3266165 }
 0x1e3   :  { %v276_v33 = vadd.f32 %v274_v14, %v270_v27  ;;  %v281_v34 = vsel %vm277_vm3, %v279_v28, %v275_v21  ;;  %v311_v35 = vsel %vm309_vm10, 0.35015237, %v530_v0  ;;  %v312_v38 = vsel %vm310_vm11, 0.35015237, %v530_v0 }
 0x1e4   :  { %v283_v36 = vmul.f32 %v281_v34, %v597_v42  ;;  %v308_v37 = vadd.f32 %v306_v31, %v302_v30  ;;  %v313_v39 = vadd.f32 %v311_v35, %v307_v32  ;;  %vm315_vm12 = vcmp.gt.f32.partialorder %v613_v55, 1.6922464 }
 0x1e5   :  { %v280_v40 = vsub.f32 0.0, %v276_v33  ;;  %vm316_vm13 = vcmp.gt.f32.partialorder %v290_v15, 1.6922464  ;;  %vm278_vm14 = vcmp.lt.f32.partialorder %v608_v52, 0.0  ;;  %v317_v43 = vsel %vm315_vm12, 0.3811072, %v530_v0 }
 0x1e6   :  { %285 = vst [vmem:[#allocation7] sm:$0xff] %v283_v36  ;;  %v314_v41 = vadd.f32 %v312_v38, %v308_v37  ;;  %vm321_vm15 = vcmp.gt.f32.partialorder %v613_v55, 2.1078198  ;;  %v318_v45 = vsel %vm316_vm13, 0.3811072, %v530_v0  ;;  %v319_v47 = vadd.f32 %v317_v43, %v313_v39 }
 0x1e7   :  { %v282_v44 = vsel %vm278_vm14, %v280_v40, %v276_v33  ;;  %vm322_vm0 = vcmp.gt.f32.partialorder %v290_v15, 2.1078198  ;;  %v323_v51 = vsel %vm321_vm15, 0.4500395, %v530_v0  ;;  %vm327_vm1 = vcmp.gt.f32.partialorder %v613_v55, 2.651416 }
 0x1e8   :  { %v284_v48 = vmul.f32 %v282_v44, %v600_v46  ;;  %v320_v50 = vadd.f32 %v318_v45, %v314_v41  ;;  %v324_v52 = vsel %vm322_vm0, 0.4500395, %v530_v0  ;;  %v325_v53 = vadd.f32 %v323_v51, %v319_v47 }
 0x1e9   :  { %vm328_vm2 = vcmp.gt.f32.partialorder %v290_v15, 2.651416  ;;  %v329_v56 = vsel %vm327_vm1, 0.63715315, %v530_v0  ;;  %vm333_vm3 = vcmp.lt.f32.partialorder %v605_v49, 0.0  ;;  %vm334_vm4 = vcmp.lt.f32.partialorder %v624_v5, 0.0 }
 0x1ea   :  { %286 = vst [vmem:[#allocation7 + $0x10] sm:$0xff] %v284_v48  ;;  %v326_v54 = vadd.f32 %v324_v52, %v320_v50  ;;  %v330_v57 = vsel %vm328_vm2, 0.63715315, %v530_v0  ;;  %v331_v58 = vadd.f32 %v329_v56, %v325_v53 }
 0x1ec   :  { %v332_v59 = vadd.f32 %v330_v57, %v326_v54  ;;  %v335_v60 = vsub.f32 0.0, %v331_v58 }
 0x1ee   :  { %v336_v61 = vsub.f32 0.0, %v332_v59  ;;  %v337_v55 = vsel %vm333_vm3, %v335_v60, %v331_v58 }
 0x1ef   :  { %v339_v63 = vmul.f32 %v337_v55, %v597_v42 }
 0x1f0   :  { %v338_v62 = vsel %vm334_vm4, %v336_v61, %v332_v59 }
 0x1f1   :  { %v340_v1 = vmul.f32 %v338_v62, %v600_v46  ;;  %341 = vst [vmem:[#allocation7 + $0x8] sm:$0xff] %v339_v63 }
 0x1f3   :  { %342 = vst [vmem:[#allocation7 + $0x18] sm:$0xff] %v340_v1 }
 0x1f4   :  { %507 = shalt.err (!%p504_p6)
}
 0x1f5   :  { %s508_s12 = scalar_lea.hbm %s680_s2, 512 }
 0x1f6   :  { %p509_p7 = scmp.ne.s32.totalorder %s680_s2, %s508_s12  ;;  %p512_p8 = scmp.lt.u32.totalorder %s508_s12, %s680_s2 }
 0x1f8   :  { %p514_p9 = pnand %p512_p8, %p509_p7 }
 0x1fa   :  { %517 = shalt.err (!%p514_p9)
}
 0x1fb   :  { %354 = dma.vmem_to_hbm [thread:$0]  %s349_s8, 512, %s680_s2, [#allocation4], %s525_s19, %s525_s19, %s526_s20  }
 0x1fc   :  { %522 = dma.done.wait [#allocation4], 512  }
 0x1fd   :  { %523 = vsyncadd [#allocation4], 4294966784 }
 0x1fe   :  { %358 = vsyncpa [#allocation3], 1 }
 0x1ff   :  { %359 = vsyncpa [#allocation6], 1 }
 0x200   :  { %360 = vsyncpa [#allocation4], 1 }

</bundles_post_ra>
